<compile_context>
chip_gen: v7x
topology: tpu7x:2x2x1
jax: 0.10.0
libtpu: 0.0.40
codegen_flags: <defaults>
</compile_context>

<pallas_src>
import math

import jax
import jax.numpy as jnp
from jax.experimental import pallas as pl
from jax.experimental.pallas import tpu as pltpu

_LANE = 128      # lane width: last dim of every tile is padded to this
_SUBLANE = 8     # sublane granularity for the batch (second-to-last) dim


def _round_up(x, m):
    return ((x + m - 1) // m) * m


def _make_head_kernel(n_mlp, use_cond):
    """Kernel for the SeqTransformerGFN `output` head (eval mode).

    use_cond=True:
        cond_var = cond @ Wc + bc                  (cond_embed)
        h = relu(x @ W1a + cond_var @ W1b + b1)    (== relu(cat(x, cond_var) @ W1 + b1))
        h = relu(h @ Wi + bi) ...  out = h @ Wn + bn
    use_cond=False:
        plain Linear/ReLU chain with a final Linear (no ReLU).
    """

    def kernel(*refs):
        o_ref = refs[-1]
        if use_cond:
            x_ref, cond_ref = refs[0], refs[1]
            wc_ref, bc_ref = refs[2], refs[3]
            w1a_ref, w1b_ref, b1_ref = refs[4], refs[5], refs[6]
            rest = refs[7:-1]
            # cond_embed linear, f32 accumulation.
            cond_var = (jnp.dot(cond_ref[...], wc_ref[...],
                                preferred_element_type=jnp.float32)
                        + bc_ref[...].astype(jnp.float32))
            # First MLP layer: split matmul replaces the concat.
            h = jnp.dot(x_ref[...], w1a_ref[...],
                        preferred_element_type=jnp.float32)
            h = h + jnp.dot(cond_var.astype(w1b_ref.dtype), w1b_ref[...],
                            preferred_element_type=jnp.float32)
            h = jnp.maximum(h + b1_ref[...].astype(jnp.float32), 0.0)
            remaining = n_mlp - 1
        else:
            x_ref = refs[0]
            rest = refs[1:-1]
            h = x_ref[...]
            remaining = n_mlp

        for i in range(remaining):
            w = rest[2 * i][...]                                 # storage dtype for MXU
            b = rest[2 * i + 1][...].astype(jnp.float32)         # (1, fan_out)
            h = jnp.dot(h.astype(w.dtype), w,
                        preferred_element_type=jnp.float32) + b
            if i < remaining - 1:        # ReLU after every layer except the last
                h = jnp.maximum(h, 0.0)
            # Dropout (eval mode) == identity: nothing to do.
        o_ref[...] = h.astype(o_ref.dtype)

    return kernel


def output_head_forward(pooled_x, mlp_params, *, cond=None, cond_params=None,
                        batch_tile=256, compute_dtype=None):
    """Fused SeqTransformerGFN output head.

    pooled_x:    [B, num_hid]                       (transformer output, pooled)
    mlp_params:  list of (W, b) with W: [fan_in, fan_out], b: [fan_out]
                 (first layer fan_in == 2*num_hid when cond is given, else num_hid)
    cond:        [B, num_cond_dim] or None
    cond_params: (Wc [num_cond_dim, num_hid], bc [num_hid]) — the cond_embed linear
    compute_dtype: dtype fed to the MXU (e.g. jnp.bfloat16 on v6e/v7x).
                   Accumulation / bias / ReLU remain f32.
    """
    use_cond = cond is not None
    B, H = pooled_x.shape
    n_mlp = len(mlp_params)
    out_dim = mlp_params[-1][0].shape[1]
    out_dtype = pooled_x.dtype
    if compute_dtype is None:
        compute_dtype = pooled_x.dtype

    Hp = _round_up(H, _LANE)
    mlp_out_dims = [w.shape[1] for (w, _) in mlp_params]
    mlp_out_p = [_round_up(d, _LANE) for d in mlp_out_dims]

    # ---- pad activations and parameters to lane-dense shapes ----------------
    x_p = jnp.pad(pooled_x.astype(compute_dtype), ((0, 0), (0, Hp - H)))

    operands = []
    if use_cond:
        Wc, bc = cond_params
        C = cond.shape[1]
        Cp = _round_up(C, _LANE)
        cond_p = jnp.pad(cond.astype(compute_dtype), ((0, 0), (0, Cp - C)))
        Wc_p = jnp.pad(Wc.astype(compute_dtype), ((0, Cp - C), (0, Hp - H)))
        bc_p = jnp.pad(bc.reshape(1, -1).astype(jnp.float32),
                       ((0, 0), (0, Hp - H)))
        W1, b1 = mlp_params[0]
        assert W1.shape[0] == 2 * H, "cond path expects first layer fan_in == 2*num_hid"
        D1, D1p = mlp_out_dims[0], mlp_out_p[0]
        W1a = jnp.pad(W1[:H].astype(compute_dtype), ((0, Hp - H), (0, D1p - D1)))
        W1b = jnp.pad(W1[H:].astype(compute_dtype), ((0, Hp - H), (0, D1p - D1)))
        b1_p = jnp.pad(b1.reshape(1, -1).astype(jnp.float32),
                       ((0, 0), (0, D1p - D1)))
        operands += [Wc_p, bc_p, W1a, W1b, b1_p]
        rest_start = 1
    else:
        rest_start = 0

    for li in range(rest_start, n_mlp):
        w, b = mlp_params[li]
        fi, fo = w.shape
        pfi = Hp if li == 0 else mlp_out_p[li - 1]
        pfo = mlp_out_p[li]
        operands.append(jnp.pad(w.astype(compute_dtype),
                                ((0, pfi - fi), (0, pfo - fo))))
        operands.append(jnp.pad(b.reshape(1, -1).astype(jnp.float32),
                                ((0, 0), (0, pfo - fo))))

    # ---- pick the batch tile; pad the batch so the grid is exact ------------
    bt = min(batch_tile, _round_up(B, _SUBLANE))
    bt = _round_up(bt, _SUBLANE)
    Bp = _round_up(B, bt)
    if Bp != B:
        x_p = jnp.pad(x_p, ((0, Bp - B), (0, 0)))     # padded rows sliced off below
        if use_cond:
            cond_p = jnp.pad(cond_p, ((0, Bp - B), (0, 0)))
    grid = (Bp // bt,)

    # ---- BlockSpecs: tile over batch, keep whole params resident ------------
    in_specs = [pl.BlockSpec((bt, Hp), lambda i: (i, 0))]
    call_args = [x_p]
    if use_cond:
        in_specs.append(pl.BlockSpec((bt, Cp), lambda i: (i, 0)))
        call_args.append(cond_p)
    for arr in operands:
        in_specs.append(pl.BlockSpec(arr.shape, lambda i: (0, 0)))
        call_args.append(arr)
    out_spec = pl.BlockSpec((bt, mlp_out_p[-1]), lambda i: (i, 0))

    # ---- advisory cost estimate for XLA's scheduler --------------------------
    mm = 0
    if use_cond:
        mm += Cp * Hp + 2 * Hp * mlp_out_p[0]
        prev = mlp_out_p[0]
        start = 1
    else:
        prev = Hp
        start = 0
    for li in range(start, n_mlp):
        mm += prev * mlp_out_p[li]
        prev = mlp_out_p[li]
    flops = 2 * Bp * mm
    bytes_accessed = (sum(a.size * a.dtype.itemsize for a in call_args)
                      + Bp * mlp_out_p[-1] * jnp.dtype(out_dtype).itemsize)
    cost = pl.CostEstimate(flops=int(flops), transcendentals=0,
                           bytes_accessed=int(bytes_accessed))

    fn = pl.pallas_call(
        _make_head_kernel(n_mlp, use_cond),
        out_shape=jax.ShapeDtypeStruct((Bp, mlp_out_p[-1]), out_dtype),
        grid_spec=pl.GridSpec(grid=grid, in_specs=in_specs, out_specs=out_spec),
        compiler_params=pltpu.CompilerParams(dimension_semantics=("parallel",)),
        cost_estimate=cost,
    )
    out_padded = fn(*call_args)
    return out_padded[:B, :out_dim]


def split_head_outputs(out, num_state_out):
    """SeqTransformerGFN's (state_preds, stop_logits, add_node_logits) slicing."""
    ns = num_state_out
    return out[:, 0:ns], out[:, ns:ns + 1], out[:, ns + 1:]


# --------------------------- init + reference --------------------------------
def _init_linear(key, fan_in, fan_out):
    """nn.Linear default init (uniform +/- 1/sqrt(fan_in)); W stored [fan_in, fan_out]."""
    kw, kb = jax.random.split(key)
    bound = 1.0 / math.sqrt(fan_in)
    w = jax.random.uniform(kw, (fan_in, fan_out), jnp.float32, -bound, bound)
    b = jax.random.uniform(kb, (fan_out,), jnp.float32, -bound, bound)
    return w, b


def init_mlp_params(key, in_dim, out_dim, hidden_layers):
    dims = [in_dim] + list(hidden_layers) + [out_dim]
    params = []
    for li in range(len(dims) - 1):
        key, sub = jax.random.split(key)
        params.append(_init_linear(sub, dims[li], dims[li + 1]))
    return params


def mlp_reference(x, params):
    h = x
    n = len(params)
    for i, (w, b) in enumerate(params):
        h = h @ w + b.reshape(1, -1)
        if i < n - 1:
            h = jnp.maximum(h, 0.0)
    return h


def head_reference(pooled_x, mlp_params, cond=None, cond_params=None):
    if cond is not None:
        Wc, bc = cond_params
        cond_var = cond @ Wc + bc.reshape(1, -1)
        final_rep = jnp.concatenate([pooled_x, cond_var], axis=-1)
    else:
        final_rep = pooled_x
    return mlp_reference(final_rep, mlp_params)


# ----------------------------------- main ------------------------------------
if __name__ == "__main__":
    # Small shapes consistent with SeqTransformerGFN:
    #   num_hid = cfg.model.num_emb, num_outs = env_ctx.num_actions + num_state_out
    num_hid = 32
    num_cond_dim = 10
    num_actions = 7
    num_state_out = 1
    num_outs = num_actions + num_state_out
    batch = 8

    key = jax.random.PRNGKey(0)
    k_x, k_c, k_cp, k_mc, k_mn, k_rx, k_rc = jax.random.split(key, 7)

    pooled_x = jax.random.normal(k_x, (batch, num_hid), jnp.float32)
    cond = jax.random.normal(k_c, (batch, num_cond_dim), jnp.float32)

    # ---- use_cond = True: MLPWithDropout(2*num_hid, num_outs, [4H, 4H]) ------
    cond_params = _init_linear(k_cp, num_cond_dim, num_hid)
    mlp_params_c = init_mlp_params(k_mc, 2 * num_hid, num_outs,
                                   [4 * num_hid, 4 * num_hid])
    ref_c = head_reference(pooled_x, mlp_params_c, cond, cond_params)
    out_c = jax.block_until_ready(
        output_head_forward(pooled_x, mlp_params_c, cond=cond,
                            cond_params=cond_params))
    assert out_c.shape == (batch, num_outs)
    assert jnp.allclose(out_c, ref_c, atol=1e-5, rtol=1e-5), "cond-path mismatch"

    state_preds, stop_logits, add_node_logits = split_head_outputs(out_c, num_state_out)
    assert state_preds.shape == (batch, num_state_out)
    assert stop_logits.shape == (batch, 1)
    assert add_node_logits.shape == (batch, num_outs - num_state_out - 1)

    # ---- use_cond = False: MLPWithDropout(num_hid, num_outs, [2H, 2H]) -------
    mlp_params_n = init_mlp_params(k_mn, num_hid, num_outs,
                                   [2 * num_hid, 2 * num_hid])
    ref_n = head_reference(pooled_x, mlp_params_n)
    out_n = jax.block_until_ready(output_head_forward(pooled_x, mlp_params_n))
    assert out_n.shape == (batch, num_outs)
    assert jnp.allclose(out_n, ref_n, atol=1e-5, rtol=1e-5), "no-cond mismatch"

    # ---- ragged batch (B not a multiple of the tile / sublane) ---------------
    xr = jax.random.normal(k_rx, (11, num_hid), jnp.float32)
    cr = jax.random.normal(k_rc, (11, num_cond_dim), jnp.float32)
    out_r = jax.block_until_ready(
        output_head_forward(xr, mlp_params_c, cond=cr, cond_params=cond_params))
    assert out_r.shape == (11, num_outs)
    assert jnp.allclose(out_r, head_reference(xr, mlp_params_c, cr, cond_params),
                        atol=1e-5, rtol=1e-5), "ragged-batch mismatch"

    # ---- bf16 MXU path (f32 accumulation) -> loose tolerance -----------------
    out_bf = jax.block_until_ready(
        output_head_forward(pooled_x, mlp_params_c, cond=cond,
                            cond_params=cond_params,
                            compute_dtype=jnp.bfloat16))
    assert out_bf.shape == (batch, num_outs)
    assert jnp.allclose(out_bf.astype(jnp.float32), ref_c, atol=1e-1, rtol=1e-1), \
        "bf16 mismatch"

    print("KERNEL_OK")
</pallas_src>

<mosaic_0001>
module attributes {stable_mosaic.version = 11 : i64} {
  func.func @kernel(%arg0: i32, %arg1: memref<8x128xf32, #tpu.memory_space<vmem>>, %arg2: memref<8x128xf32, #tpu.memory_space<vmem>>, %arg3: memref<128x128xf32, #tpu.memory_space<vmem>>, %arg4: memref<1x128xf32, #tpu.memory_space<vmem>>, %arg5: memref<128x128xf32, #tpu.memory_space<vmem>>, %arg6: memref<128x128xf32, #tpu.memory_space<vmem>>, %arg7: memref<1x128xf32, #tpu.memory_space<vmem>>, %arg8: memref<128x128xf32, #tpu.memory_space<vmem>>, %arg9: memref<1x128xf32, #tpu.memory_space<vmem>>, %arg10: memref<128x128xf32, #tpu.memory_space<vmem>>, %arg11: memref<1x128xf32, #tpu.memory_space<vmem>>, %arg12: memref<8x128xf32, #tpu.memory_space<vmem>>) attributes {dimension_semantics = [#tpu.dimension_semantics<parallel>], iteration_bounds = array<i64: 1>, scalar_prefetch = 0 : i64, scratch_operands = 0 : i64, tpu.core_type = #tpu.core_type<tc>, window_params = [{transform_indices = @transform_0, window_bounds = array<i64: 8, 128>}, {transform_indices = @transform_1, window_bounds = array<i64: 8, 128>}, {pipeline_mode = #tpu.pipeline_mode<synchronous>, transform_indices = @transform_2, window_bounds = array<i64: 128, 128>}, {pipeline_mode = #tpu.pipeline_mode<synchronous>, transform_indices = @transform_3, window_bounds = array<i64: 1, 128>}, {pipeline_mode = #tpu.pipeline_mode<synchronous>, transform_indices = @transform_4, window_bounds = array<i64: 128, 128>}, {pipeline_mode = #tpu.pipeline_mode<synchronous>, transform_indices = @transform_5, window_bounds = array<i64: 128, 128>}, {pipeline_mode = #tpu.pipeline_mode<synchronous>, transform_indices = @transform_6, window_bounds = array<i64: 1, 128>}, {pipeline_mode = #tpu.pipeline_mode<synchronous>, transform_indices = @transform_7, window_bounds = array<i64: 128, 128>}, {pipeline_mode = #tpu.pipeline_mode<synchronous>, transform_indices = @transform_8, window_bounds = array<i64: 1, 128>}, {pipeline_mode = #tpu.pipeline_mode<synchronous>, transform_indices = @transform_9, window_bounds = array<i64: 128, 128>}, {pipeline_mode = #tpu.pipeline_mode<synchronous>, transform_indices = @transform_10, window_bounds = array<i64: 1, 128>}, {transform_indices = @transform_11, window_bounds = array<i64: 8, 128>}]} {
    %c0 = arith.constant 0 : index
    %c0_0 = arith.constant 0 : index
    %0 = vector.load %arg2[%c0, %c0_0] : memref<8x128xf32, #tpu.memory_space<vmem>>, vector<8x128xf32>
    %c0_1 = arith.constant 0 : index
    %c0_2 = arith.constant 0 : index
    %1 = vector.load %arg3[%c0_1, %c0_2] : memref<128x128xf32, #tpu.memory_space<vmem>>, vector<128x128xf32>
    %cst = arith.constant dense<0.000000e+00> : vector<8x128xf32>
    %2 = tpu.matmul %0, %1, %cst {dimension_numbers = #tpu.dot_dimension_numbers<[1], [0], [0], [1], [0, 0, 1, 1], [], []>} : vector<8x128xf32>, vector<128x128xf32>, vector<8x128xf32> -> vector<8x128xf32>
    %c0_3 = arith.constant 0 : index
    %c0_4 = arith.constant 0 : index
    %3 = vector.load %arg4[%c0_3, %c0_4] : memref<1x128xf32, #tpu.memory_space<vmem>>, vector<1x128xf32>
    %4 = vector.broadcast %3 : vector<1x128xf32> to vector<8x128xf32>
    %5 = arith.addf %2, %4 : vector<8x128xf32>
    %c0_5 = arith.constant 0 : index
    %c0_6 = arith.constant 0 : index
    %6 = vector.load %arg1[%c0_5, %c0_6] : memref<8x128xf32, #tpu.memory_space<vmem>>, vector<8x128xf32>
    %c0_7 = arith.constant 0 : index
    %c0_8 = arith.constant 0 : index
    %7 = vector.load %arg5[%c0_7, %c0_8] : memref<128x128xf32, #tpu.memory_space<vmem>>, vector<128x128xf32>
    %cst_9 = arith.constant dense<0.000000e+00> : vector<8x128xf32>
    %8 = tpu.matmul %6, %7, %cst_9 {dimension_numbers = #tpu.dot_dimension_numbers<[1], [0], [0], [1], [0, 0, 1, 1], [], []>} : vector<8x128xf32>, vector<128x128xf32>, vector<8x128xf32> -> vector<8x128xf32>
    %c0_10 = arith.constant 0 : index
    %c0_11 = arith.constant 0 : index
    %9 = vector.load %arg6[%c0_10, %c0_11] : memref<128x128xf32, #tpu.memory_space<vmem>>, vector<128x128xf32>
    %cst_12 = arith.constant dense<0.000000e+00> : vector<8x128xf32>
    %10 = tpu.matmul %5, %9, %cst_12 {dimension_numbers = #tpu.dot_dimension_numbers<[1], [0], [0], [1], [0, 0, 1, 1], [], []>} : vector<8x128xf32>, vector<128x128xf32>, vector<8x128xf32> -> vector<8x128xf32>
    %11 = arith.addf %8, %10 : vector<8x128xf32>
    %c0_13 = arith.constant 0 : index
    %c0_14 = arith.constant 0 : index
    %12 = vector.load %arg7[%c0_13, %c0_14] : memref<1x128xf32, #tpu.memory_space<vmem>>, vector<1x128xf32>
    %13 = vector.broadcast %12 : vector<1x128xf32> to vector<8x128xf32>
    %14 = arith.addf %11, %13 : vector<8x128xf32>
    %cst_15 = arith.constant 0.000000e+00 : f32
    %15 = vector.broadcast %cst_15 : f32 to vector<8x128xf32>
    %16 = arith.maximumf %14, %15 : vector<8x128xf32>
    %c0_16 = arith.constant 0 : index
    %c0_17 = arith.constant 0 : index
    %17 = vector.load %arg8[%c0_16, %c0_17] : memref<128x128xf32, #tpu.memory_space<vmem>>, vector<128x128xf32>
    %c0_18 = arith.constant 0 : index
    %c0_19 = arith.constant 0 : index
    %18 = vector.load %arg9[%c0_18, %c0_19] : memref<1x128xf32, #tpu.memory_space<vmem>>, vector<1x128xf32>
    %cst_20 = arith.constant dense<0.000000e+00> : vector<8x128xf32>
    %19 = tpu.matmul %16, %17, %cst_20 {dimension_numbers = #tpu.dot_dimension_numbers<[1], [0], [0], [1], [0, 0, 1, 1], [], []>} : vector<8x128xf32>, vector<128x128xf32>, vector<8x128xf32> -> vector<8x128xf32>
    %20 = vector.broadcast %18 : vector<1x128xf32> to vector<8x128xf32>
    %21 = arith.addf %19, %20 : vector<8x128xf32>
    %cst_21 = arith.constant 0.000000e+00 : f32
    %22 = vector.broadcast %cst_21 : f32 to vector<8x128xf32>
    %23 = arith.maximumf %21, %22 : vector<8x128xf32>
    %c0_22 = arith.constant 0 : index
    %c0_23 = arith.constant 0 : index
    %24 = vector.load %arg10[%c0_22, %c0_23] : memref<128x128xf32, #tpu.memory_space<vmem>>, vector<128x128xf32>
    %c0_24 = arith.constant 0 : index
    %c0_25 = arith.constant 0 : index
    %25 = vector.load %arg11[%c0_24, %c0_25] : memref<1x128xf32, #tpu.memory_space<vmem>>, vector<1x128xf32>
    %cst_26 = arith.constant dense<0.000000e+00> : vector<8x128xf32>
    %26 = tpu.matmul %23, %24, %cst_26 {dimension_numbers = #tpu.dot_dimension_numbers<[1], [0], [0], [1], [0, 0, 1, 1], [], []>} : vector<8x128xf32>, vector<128x128xf32>, vector<8x128xf32> -> vector<8x128xf32>
    %27 = vector.broadcast %25 : vector<1x128xf32> to vector<8x128xf32>
    %28 = arith.addf %26, %27 : vector<8x128xf32>
    %c0_27 = arith.constant 0 : index
    %c0_28 = arith.constant 0 : index
    %29 = vector.load %arg12[%c0_27, %c0_28] : memref<8x128xf32, #tpu.memory_space<vmem>>, vector<8x128xf32>
    tpu.vector_store %arg12[%c0_27, %c0_28], %28 {strides = array<i32>} : memref<8x128xf32, #tpu.memory_space<vmem>>, vector<8x128xf32>,
    return
  }
  func.func @transform_0(%arg0: i32) -> (i32, i32) {
    %c0_i32 = arith.constant 0 : i32
    %c0_i32_0 = arith.constant 0 : i32
    return %arg0, %c0_i32 : i32, i32
  }
  func.func @transform_1(%arg0: i32) -> (i32, i32) {
    %c0_i32 = arith.constant 0 : i32
    %c0_i32_0 = arith.constant 0 : i32
    return %arg0, %c0_i32 : i32, i32
  }
  func.func @transform_2(%arg0: i32) -> (i32, i32) {
    %c0_i32 = arith.constant 0 : i32
    %c0_i32_0 = arith.constant 0 : i32
    %c0_i32_1 = arith.constant 0 : i32
    return %c0_i32, %c0_i32_0 : i32, i32
  }
  func.func @transform_3(%arg0: i32) -> (i32, i32) {
    %c0_i32 = arith.constant 0 : i32
    %c0_i32_0 = arith.constant 0 : i32
    %c0_i32_1 = arith.constant 0 : i32
    return %c0_i32, %c0_i32_0 : i32, i32
  }
  func.func @transform_4(%arg0: i32) -> (i32, i32) {
    %c0_i32 = arith.constant 0 : i32
    %c0_i32_0 = arith.constant 0 : i32
    %c0_i32_1 = arith.constant 0 : i32
    return %c0_i32, %c0_i32_0 : i32, i32
  }
  func.func @transform_5(%arg0: i32) -> (i32, i32) {
    %c0_i32 = arith.constant 0 : i32
    %c0_i32_0 = arith.constant 0 : i32
    %c0_i32_1 = arith.constant 0 : i32
    return %c0_i32, %c0_i32_0 : i32, i32
  }
  func.func @transform_6(%arg0: i32) -> (i32, i32) {
    %c0_i32 = arith.constant 0 : i32
    %c0_i32_0 = arith.constant 0 : i32
    %c0_i32_1 = arith.constant 0 : i32
    return %c0_i32, %c0_i32_0 : i32, i32
  }
  func.func @transform_7(%arg0: i32) -> (i32, i32) {
    %c0_i32 = arith.constant 0 : i32
    %c0_i32_0 = arith.constant 0 : i32
    %c0_i32_1 = arith.constant 0 : i32
    return %c0_i32, %c0_i32_0 : i32, i32
  }
  func.func @transform_8(%arg0: i32) -> (i32, i32) {
    %c0_i32 = arith.constant 0 : i32
    %c0_i32_0 = arith.constant 0 : i32
    %c0_i32_1 = arith.constant 0 : i32
    return %c0_i32, %c0_i32_0 : i32, i32
  }
  func.func @transform_9(%arg0: i32) -> (i32, i32) {
    %c0_i32 = arith.constant 0 : i32
    %c0_i32_0 = arith.constant 0 : i32
    %c0_i32_1 = arith.constant 0 : i32
    return %c0_i32, %c0_i32_0 : i32, i32
  }
  func.func @transform_10(%arg0: i32) -> (i32, i32) {
    %c0_i32 = arith.constant 0 : i32
    %c0_i32_0 = arith.constant 0 : i32
    %c0_i32_1 = arith.constant 0 : i32
    return %c0_i32, %c0_i32_0 : i32, i32
  }
  func.func @transform_11(%arg0: i32) -> (i32, i32) {
    %c0_i32 = arith.constant 0 : i32
    %c0_i32_0 = arith.constant 0 : i32
    return %arg0, %c0_i32 : i32, i32
  }
}

</mosaic_0001>

<bundles_post_ra>
// kernel: tpu_custom_call.1
= control target key start
LH: loop header
LB: loop body
LE: loop exit
PB: predicated region body
PF: predicated region fallthrough
CT: control target
= control target key end

     0   :  { %16 = vsyncpa [#allocation3], 0  ;;  %s1441_s0 = inlined_call_operand.hbm [shape: f32[8,128], index: 0, kind: input, shape index: {}]   ;;  %s1442_s1 = inlined_call_operand.hbm [shape: f32[8,128], index: 1, kind: input, shape index: {}]   ;;  %s1443_s2 = inlined_call_operand.hbm [shape: f32[128,128], index: 2, kind: input, shape index: {}]   ;;  %s1444_s3 = inlined_call_operand.vmem [shape: f32[1,128], index: 3, kind: input, shape index: {}]   ;;  %s1445_s4 = inlined_call_operand.hbm [shape: f32[128,128], index: 4, kind: input, shape index: {}]   ;;  %s1446_s5 = inlined_call_operand.hbm [shape: f32[128,128], index: 5, kind: input, shape index: {}]   ;;  %s1447_s6 = inlined_call_operand.vmem [shape: f32[1,128], index: 6, kind: input, shape index: {}]   ;;  %s1448_s7 = inlined_call_operand.hbm [shape: f32[128,128], index: 7, kind: input, shape index: {}]   ;;  %s1449_s8 = inlined_call_operand.vmem [shape: f32[1,128], index: 8, kind: input, shape index: {}]   ;;  %s1450_s9 = inlined_call_operand.hbm [shape: f32[128,128], index: 9, kind: input, shape index: {}]   ;;  %s1451_s10 = inlined_call_operand.vmem [shape: f32[1,128], index: 10, kind: input, shape index: {}]   ;;  %s1452_s11 = inlined_call_operand.hbm [shape: f32[8,128], index: 11, kind: output, shape index: {}]  }
   0x1   :  { %17 = vsyncpa [#allocation6], 0 }
   0x2   :  { %18 = vsyncpa [#allocation9], 0 }
   0x3   :  { %19 = vsyncpa [#allocation12], 0 }
   0x4   :  { %20 = vsyncpa [#allocation4], 0  ;;  %s1195_s17 = smov [#allocation5]   ;;  %s1009_s21 = scalar_lea.hbm %s1442_s1, 128 }
   0x5   :  { %s37_s18 = sshll.u32 %s1195_s17, 4  ;;  %p1010_p0 = scmp.ne.s32.totalorder %s1442_s1, %s1009_s21  ;;  %s38_s18 = int_to_ptr.vmem [resolvable:$true] %s37_s18 }
   0x6   :  { %p1013_p1 = scmp.lt.u32.totalorder %s1009_s21, %s1442_s1 }
   0x8   :  { %p1015_p2 = pnand %p1013_p1, %p1010_p0 }
   0xa   :  { %1018 = shalt.err (!%p1015_p2)
}
   0xb   :  { %s1019_s26 = scalar_lea.vmem %s38_s18, 128  ;;  %p1024_p4 = scmp.lt.s32.totalorder %s38_s18, %s38_s18 }
   0xc   :  { %p1020_p3 = scmp.ne.s32.totalorder %s38_s18, %s1019_s26  ;;  %p1025_p5 = scmp.lt.s32.totalorder %s1019_s26, %s1019_s26 }
   0xe   :  { %p1026_p6 = por %p1025_p5, %p1024_p4 }
  0x10   :  { %p1027_p7 = pnand %p1026_p6, %p1020_p3 }
  0x12   :  { %1030 = shalt.err (!%p1027_p7)
}
  0x13   :  { %40 = dma.hbm_to_vmem [thread:$0]  %s1442_s1, 128, %s38_s18, [#allocation6]  }
  0x14   :  { %s1196_s29 = smov [#allocation8]   ;;  %s1197_s12 = smov [#allocation11]  }
  0x15   :  { %s60_s30 = sshll.u32 %s1196_s29, 4  ;;  %s86_s13 = sshll.u32 %s1197_s12, 4  ;;  %s61_s30 = int_to_ptr.vmem [resolvable:$true] %s60_s30  ;;  %s87_s13 = int_to_ptr.vmem [resolvable:$true] %s86_s13 }
  0x16   :  { %s1031_s16 = scalar_lea.hbm %s1445_s4, 2048 }
  0x17   :  { %p1032_p8 = scmp.ne.s32.totalorder %s1445_s4, %s1031_s16  ;;  %p1035_p9 = scmp.lt.u32.totalorder %s1031_s16, %s1445_s4 }
  0x19   :  { %p1037_p10 = pnand %p1035_p9, %p1032_p8 }
  0x1b   :  { %1040 = shalt.err (!%p1037_p10)
}
  0x1c   :  { %s1041_s1 = scalar_lea.vmem %s61_s30, 2048  ;;  %p1046_p12 = scmp.lt.s32.totalorder %s61_s30, %s61_s30 }
  0x1d   :  { %p1042_p11 = scmp.ne.s32.totalorder %s61_s30, %s1041_s1  ;;  %p1047_p13 = scmp.lt.s32.totalorder %s1041_s1, %s1041_s1 }
  0x1f   :  { %p1048_p0 = por %p1047_p13, %p1046_p12 }
  0x21   :  { %p1049_p1 = pnand %p1048_p0, %p1042_p11 }
  0x23   :  { %1052 = shalt.err (!%p1049_p1)
}
  0x24   :  { %s1198_s18 = smov 128   ;;  %s1199_s22 = smov 8  }
  0x25   :  { %66 = dma.hbm_to_vmem [thread:$0]  %s1445_s4, 2048, %s61_s30, [#allocation9], %s1198_s18, %s1198_s18, %s1199_s22  }
  0x26   :  { %s1053_s27 = scalar_lea.hbm %s1448_s7, 2048 }
  0x27   :  { %p1054_p2 = scmp.ne.s32.totalorder %s1448_s7, %s1053_s27  ;;  %p1057_p3 = scmp.lt.u32.totalorder %s1053_s27, %s1448_s7 }
  0x29   :  { %p1059_p4 = pnand %p1057_p3, %p1054_p2 }
  0x2b   :  { %1062 = shalt.err (!%p1059_p4)
}
  0x2c   :  { %s1063_s15 = scalar_lea.vmem %s87_s13, 2048  ;;  %p1068_p6 = scmp.lt.s32.totalorder %s87_s13, %s87_s13 }
  0x2d   :  { %p1064_p5 = scmp.ne.s32.totalorder %s87_s13, %s1063_s15  ;;  %p1069_p7 = scmp.lt.s32.totalorder %s1063_s15, %s1063_s15 }
  0x2f   :  { %p1070_p8 = por %p1069_p7, %p1068_p6 }
  0x31   :  { %p1071_p9 = pnand %p1070_p8, %p1064_p5 }
  0x33   :  { %1074 = shalt.err (!%p1071_p9)
}
  0x34   :  { %92 = dma.hbm_to_vmem [thread:$0]  %s1448_s7, 2048, %s87_s13, [#allocation12], %s1198_s18, %s1198_s18, %s1199_s22  }
  0x35   :  { %s1200_s16 = smov [#allocation2]   ;;  %s1201_s19 = smov [#allocation7]  }
  0x36   :  { %s27_s17 = sshll.u32 %s1200_s16, 4  ;;  %s46_s20 = sshll.u32 %s1201_s19, 4  ;;  %s28_s17 = int_to_ptr.vmem [resolvable:$true] %s27_s17  ;;  %s47_s20 = int_to_ptr.vmem [resolvable:$true] %s46_s20 }
  0x37   :  { %s1075_s23 = scalar_lea.hbm %s1441_s0, 128 }
  0x38   :  { %p1076_p10 = scmp.ne.s32.totalorder %s1441_s0, %s1075_s23  ;;  %p1079_p11 = scmp.lt.u32.totalorder %s1075_s23, %s1441_s0 }
  0x3a   :  { %p1081_p12 = pnand %p1079_p11, %p1076_p10 }
  0x3c   :  { %1084 = shalt.err (!%p1081_p12)
}
  0x3d   :  { %s1085_s7 = scalar_lea.vmem %s28_s17, 128  ;;  %p1090_p0 = scmp.lt.s32.totalorder %s28_s17, %s28_s17 }
  0x3e   :  { %p1086_p13 = scmp.ne.s32.totalorder %s28_s17, %s1085_s7  ;;  %p1091_p1 = scmp.lt.s32.totalorder %s1085_s7, %s1085_s7 }
  0x40   :  { %p1092_p2 = por %p1091_p1, %p1090_p0 }
  0x42   :  { %p1093_p3 = pnand %p1092_p2, %p1086_p13 }
  0x44   :  { %1096 = shalt.err (!%p1093_p3)
}
  0x45   :  { %30 = dma.hbm_to_vmem [thread:$0]  %s1441_s0, 128, %s28_s17, [#allocation3]  }
  0x46   :  { %s1097_s14 = scalar_lea.hbm %s1443_s2, 2048 }
  0x47   :  { %p1098_p4 = scmp.ne.s32.totalorder %s1443_s2, %s1097_s14  ;;  %p1101_p5 = scmp.lt.u32.totalorder %s1097_s14, %s1443_s2 }
  0x49   :  { %p1103_p6 = pnand %p1101_p5, %p1098_p4 }
  0x4b   :  { %1106 = shalt.err (!%p1103_p6)
}
  0x4c   :  { %s1107_s19 = scalar_lea.vmem %s47_s20, 2048  ;;  %p1112_p8 = scmp.lt.s32.totalorder %s47_s20, %s47_s20 }
  0x4d   :  { %p1108_p7 = scmp.ne.s32.totalorder %s47_s20, %s1107_s19  ;;  %p1113_p9 = scmp.lt.s32.totalorder %s1107_s19, %s1107_s19 }
  0x4f   :  { %p1114_p10 = por %p1113_p9, %p1112_p8 }
  0x51   :  { %p1115_p11 = pnand %p1114_p10, %p1108_p7 }
  0x53   :  { %1118 = shalt.err (!%p1115_p11)
}
  0x54   :  { %52 = dma.hbm_to_vmem [thread:$0]  %s1443_s2, 2048, %s47_s20, [#allocation6], %s1198_s18, %s1198_s18, %s1199_s22  }
  0x55   :  { %s1202_s21 = smov [#allocation10]   ;;  %s1203_s23 = smov [#allocation13]  }
  0x56   :  { %s72_s1 = sshll.u32 %s1202_s21, 4  ;;  %s100_s24 = sshll.u32 %s1203_s23, 4  ;;  %s73_s1 = int_to_ptr.vmem [resolvable:$true] %s72_s1  ;;  %s101_s24 = int_to_ptr.vmem [resolvable:$true] %s100_s24 }
  0x57   :  { %s1119_s27 = scalar_lea.hbm %s1446_s5, 2048 }
  0x58   :  { %p1120_p12 = scmp.ne.s32.totalorder %s1446_s5, %s1119_s27  ;;  %p1123_p13 = scmp.lt.u32.totalorder %s1119_s27, %s1446_s5 }
  0x5a   :  { %p1125_p0 = pnand %p1123_p13, %p1120_p12 }
  0x5c   :  { %1128 = shalt.err (!%p1125_p0)
}
  0x5d   :  { %s1129_s2 = scalar_lea.vmem %s73_s1, 2048  ;;  %p1134_p2 = scmp.lt.s32.totalorder %s73_s1, %s73_s1 }
  0x5e   :  { %p1130_p1 = scmp.ne.s32.totalorder %s73_s1, %s1129_s2  ;;  %p1135_p3 = scmp.lt.s32.totalorder %s1129_s2, %s1129_s2 }
  0x60   :  { %p1136_p4 = por %p1135_p3, %p1134_p2 }
  0x62   :  { %p1137_p5 = pnand %p1136_p4, %p1130_p1 }
  0x64   :  { %1140 = shalt.err (!%p1137_p5)
}
  0x65   :  { %78 = dma.hbm_to_vmem [thread:$0]  %s1446_s5, 2048, %s73_s1, [#allocation9], %s1198_s18, %s1198_s18, %s1199_s22  }
  0x66   :  { %s1141_s4 = scalar_lea.hbm %s1450_s9, 2048 }
  0x67   :  { %p1142_p6 = scmp.ne.s32.totalorder %s1450_s9, %s1141_s4  ;;  %p1145_p7 = scmp.lt.u32.totalorder %s1141_s4, %s1450_s9 }
  0x69   :  { %p1147_p8 = pnand %p1145_p7, %p1142_p6 }
  0x6b   :  { %1150 = shalt.err (!%p1147_p8)
}
  0x6c   :  { %s1151_s17 = scalar_lea.vmem %s101_s24, 2048  ;;  %p1156_p10 = scmp.lt.s32.totalorder %s101_s24, %s101_s24 }
  0x6d   :  { %p1152_p9 = scmp.ne.s32.totalorder %s101_s24, %s1151_s17  ;;  %p1157_p11 = scmp.lt.s32.totalorder %s1151_s17, %s1151_s17 }
  0x6f   :  { %p1158_p12 = por %p1157_p11, %p1156_p10 }
  0x71   :  { %p1159_p13 = pnand %p1158_p12, %p1152_p9 }
  0x73   :  { %1162 = shalt.err (!%p1159_p13)
}
  0x74   :  { %106 = dma.hbm_to_vmem [thread:$0]  %s1450_s9, 2048, %s101_s24, [#allocation12], %s1198_s18, %s1198_s18, %s1199_s22  }
  0x75   :  { %1185 = dma.done.wait [#allocation3], 128  }
  0x76   :  { %1186 = vsyncadd [#allocation3], 4294967168 }
  0x77   :  { %1187 = dma.done.wait [#allocation6], 2176  }
  0x78   :  { %1188 = vsyncadd [#allocation6], 4294965120 }
  0x79   :  { %1189 = dma.done.wait [#allocation9], 4096  }
  0x7a   :  { %1190 = vsyncadd [#allocation9], 4294963200 }
  0x7b   :  { %1191 = dma.done.wait [#allocation12], 4096  }
  0x7c   :  { %1192 = vsyncadd [#allocation12], 4294963200  ;;  %v1204_v0 = vmov 0.0|0.0   ;;  %vm1205_vm0 = vmmov 0   ;;  %v1206_v1 = vmov 0.0   ;;  %v131_v2 = vld [vmem:[#allocation7] sm:$0xff] }
  0x7d   :  { %876 = vmatprep.subr.bf16.mxu0 %v1204_v0  ;;  %733 = vmatprep.mubr.msk.f32.mxu0 %vm1205_vm0, %v1206_v1  ;;  %v132_v3 = vld [vmem:[#allocation7 + $0x8] sm:$0xff]  ;;  %v133_v4 = vld [vmem:[#allocation7 + $0x10] sm:$0xff]  ;;  %v134_v6 = vld [vmem:[#allocation7 + $0x18] sm:$0xff]  ;;  %s1207_s25 = smov [#allocation14]  }
  0x7e   :  { %900 = vmatprep.subr.bf16.mxu1 %v1204_v0  ;;  %768 = vmatprep.mubr.msk.f32.mxu1 %vm1205_vm0, %v1206_v1  ;;  %v877_v5 = vpack.c.bf16 %v132_v3, %v131_v2  ;;  %v880_v7 = vpack.c.bf16 %v134_v6, %v133_v4  ;;  %v135_v8 = vld [vmem:[#allocation7 + $0x20] sm:$0xff]  ;;  %v136_v9 = vld [vmem:[#allocation7 + $0x28] sm:$0xff]  ;;  %v243_v14 = vld [vmem:[#allocation10 + $0x10] sm:$0xff]  ;;  %s600_s26 = sshll.u32 %s1207_s25, 4  ;;  %s601_s26 = int_to_ptr.vmem [resolvable:$true] %s600_s26 }
  0x7f   :  { %v241_v10 = vld [vmem:[#allocation10] sm:$0xff]  ;;  %v242_v11 = vld [vmem:[#allocation10 + $0x8] sm:$0xff]  ;;  %v883_v12 = vpack.c.bf16 %v136_v9, %v135_v8  ;;  %v137_v15 = vld [vmem:[#allocation7 + $0x30] sm:$0xff]  ;;  %s1163_s27 = scalar_lea.vmem %s601_s26, 128  ;;  %p1168_p1 = scmp.lt.s32.totalorder %s601_s26, %s601_s26 }
  0x80   :  { %878 = vmatpush3.bf16.msra.mxu0 %v877_v5  ;;  %v901_v13 = vpack.c.bf16 %v242_v11, %v241_v10  ;;  %v138_v16 = vld [vmem:[#allocation7 + $0x38] sm:$0xff]  ;;  %v245_v19 = vld [vmem:[#allocation10 + $0x20] sm:$0xff]  ;;  %v246_v20 = vld [vmem:[#allocation10 + $0x28] sm:$0xff]  ;;  %p1164_p0 = scmp.ne.s32.totalorder %s601_s26, %s1163_s27  ;;  %p1169_p2 = scmp.lt.s32.totalorder %s1163_s27, %s1163_s27 }
  0x81   :  { %879 = vmatprep.subr.bf16.mxu0 %v1204_v0  ;;  %v244_v17 = vld [vmem:[#allocation10 + $0x18] sm:$0xff]  ;;  %v886_v21 = vpack.c.bf16 %v138_v16, %v137_v15  ;;  %v139_v22 = vld [vmem:[#allocation7 + $0x40] sm:$0xff]  ;;  %v140_v23 = vld [vmem:[#allocation7 + $0x48] sm:$0xff]  ;;  %v907_v24 = vpack.c.bf16 %v246_v20, %v245_v19 }
  0x82   :  { %902 = vmatpush3.bf16.msra.mxu1 %v901_v13  ;;  %v904_v18 = vpack.c.bf16 %v244_v17, %v243_v14  ;;  %v247_v25 = vld [vmem:[#allocation10 + $0x30] sm:$0xff]  ;;  %v248_v26 = vld [vmem:[#allocation10 + $0x38] sm:$0xff]  ;;  %v889_v27 = vpack.c.bf16 %v140_v23, %v139_v22  ;;  %v249_v31 = vld [vmem:[#allocation10 + $0x40] sm:$0xff]  ;;  %p1170_p3 = por %p1169_p2, %p1168_p1 }
  0x83   :  { %903 = vmatprep.subr.bf16.mxu1 %v1204_v0  ;;  %v141_v28 = vld [vmem:[#allocation7 + $0x50] sm:$0xff]  ;;  %v142_v29 = vld [vmem:[#allocation7 + $0x58] sm:$0xff]  ;;  %v910_v30 = vpack.c.bf16 %v248_v26, %v247_v25  ;;  %v250_v32 = vld [vmem:[#allocation10 + $0x48] sm:$0xff] }
  0x84   :  { %881 = vmatpush3.bf16.msra.mxu0 %v880_v7  ;;  %v892_v33 = vpack.c.bf16 %v142_v29, %v141_v28  ;;  %v143_v34 = vld [vmem:[#allocation7 + $0x60] sm:$0xff]  ;;  %v144_v35 = vld [vmem:[#allocation7 + $0x68] sm:$0xff]  ;;  %v913_v36 = vpack.c.bf16 %v250_v32, %v249_v31  ;;  %v251_v37 = vld [vmem:[#allocation10 + $0x50] sm:$0xff]  ;;  %p1171_p4 = pnand %p1170_p3, %p1164_p0 }
  0x85   :  { %882 = vmatprep.subr.bf16.mxu0 %v1204_v0  ;;  %v252_v38 = vld [vmem:[#allocation10 + $0x58] sm:$0xff]  ;;  %v895_v39 = vpack.c.bf16 %v144_v35, %v143_v34  ;;  %v145_v40 = vld [vmem:[#allocation7 + $0x70] sm:$0xff]  ;;  %v253_v43 = vld [vmem:[#allocation10 + $0x60] sm:$0xff] }
  0x86   :  { %905 = vmatpush3.bf16.msra.mxu1 %v904_v18  ;;  %v146_v41 = vld [vmem:[#allocation7 + $0x78] sm:$0xff]  ;;  %v916_v42 = vpack.c.bf16 %v252_v38, %v251_v37  ;;  %v254_v44 = vld [vmem:[#allocation10 + $0x68] sm:$0xff]  ;;  %v225_v46 = vld [vmem:[#allocation8] sm:$0xff] }
  0x87   :  { %906 = vmatprep.subr.bf16.mxu1 %v1204_v0  ;;  %v898_v45 = vpack.c.bf16 %v146_v41, %v145_v40  ;;  %v226_v47 = vld [vmem:[#allocation8 + $0x8] sm:$0xff]  ;;  %v919_v48 = vpack.c.bf16 %v254_v44, %v253_v43  ;;  %v130_v49 = vld [vmem:[#allocation5] sm:$0xff]  ;;  %v227_v51 = vld [vmem:[#allocation8 + $0x10] sm:$0xff] }
  0x88   :  { %884 = vmatpush3.bf16.msra.mxu0 %v883_v12  ;;  %v925_v50 = vpack.c.bf16 %v226_v47, %v225_v46  ;;  %v228_v52 = vld [vmem:[#allocation8 + $0x18] sm:$0xff]  ;;  %v229_v54 = vld [vmem:[#allocation8 + $0x20] sm:$0xff]  ;;  %v230_v55 = vld [vmem:[#allocation8 + $0x28] sm:$0xff] }
  0x89   :  { %885 = vmatprep.subr.bf16.mxu0 %v1204_v0  ;;  %v928_v53 = vpack.c.bf16 %v228_v52, %v227_v51  ;;  %v931_v56 = vpack.c.bf16 %v230_v55, %v229_v54  ;;  %v231_v57 = vld [vmem:[#allocation8 + $0x30] sm:$0xff]  ;;  %v232_v58 = vld [vmem:[#allocation8 + $0x38] sm:$0xff]  ;;  %v233_v60 = vld [vmem:[#allocation8 + $0x40] sm:$0xff] }
  0x8a   :  { %908 = vmatpush3.bf16.msra.mxu1 %v907_v24  ;;  %v934_v59 = vpack.c.bf16 %v232_v58, %v231_v57  ;;  %v234_v61 = vld [vmem:[#allocation8 + $0x48] sm:$0xff]  ;;  %v235_v63 = vld [vmem:[#allocation8 + $0x50] sm:$0xff]  ;;  %v236_v2 = vld [vmem:[#allocation8 + $0x58] sm:$0xff] }
  0x8b   :  { %909 = vmatprep.subr.bf16.mxu1 %v1204_v0  ;;  %v937_v62 = vpack.c.bf16 %v234_v61, %v233_v60  ;;  %v940_v3 = vpack.c.bf16 %v236_v2, %v235_v63  ;;  %v237_v4 = vld [vmem:[#allocation8 + $0x60] sm:$0xff]  ;;  %v238_v5 = vld [vmem:[#allocation8 + $0x68] sm:$0xff]  ;;  %v239_v7 = vld [vmem:[#allocation8 + $0x70] sm:$0xff] }
  0x8c   :  { %887 = vmatpush3.bf16.msra.mxu0 %v886_v21  ;;  %v943_v6 = vpack.c.bf16 %v238_v5, %v237_v4  ;;  %v240_v8 = vld [vmem:[#allocation8 + $0x78] sm:$0xff]  ;;  %v255_v10 = vld [vmem:[#allocation10 + $0x70] sm:$0xff]  ;;  %v406_v14 = vld [vmem:[#allocation11] sm:$0xff] }
  0x8d   :  { %888 = vmatprep.subr.bf16.mxu0 %v1204_v0  ;;  %v946_v9 = vpack.c.bf16 %v240_v8, %v239_v7  ;;  %v256_v11 = vld [vmem:[#allocation10 + $0x78] sm:$0xff]  ;;  %v224_v13 = vld [vmem:[#allocation2] sm:$0xff]  ;;  %v407_v15 = vld [vmem:[#allocation11 + $0x8] sm:$0xff] }
  0x8e   :  { %911 = vmatpush3.bf16.msra.mxu1 %v910_v30  ;;  %v922_v12 = vpack.c.bf16 %v256_v11, %v255_v10  ;;  %v612_v16 = vld [vmem:[%s1444_s3] ss:$0 sm:$0xff]  ;;  %v949_v18 = vpack.c.bf16 %v407_v15, %v406_v14  ;;  %v409_v22 = vld [vmem:[#allocation11 + $0x18] sm:$0xff]  ;;  %v410_v24 = vld [vmem:[#allocation11 + $0x20] sm:$0xff] }
  0x8f   :  { %912 = vmatprep.subr.bf16.mxu1 %v1204_v0  ;;  %v408_v21 = vld [vmem:[#allocation11 + $0x10] sm:$0xff]  ;;  %v411_v25 = vld [vmem:[#allocation11 + $0x28] sm:$0xff]  ;;  %v413_v28 = vld [vmem:[#allocation11 + $0x38] sm:$0xff] }
  0x90   :  { %890 = vmatpush3.bf16.msra.mxu0 %v889_v27  ;;  %v952_v23 = vpack.c.bf16 %v409_v22, %v408_v21  ;;  %v955_v26 = vpack.c.bf16 %v411_v25, %v410_v24  ;;  %v412_v27 = vld [vmem:[#allocation11 + $0x30] sm:$0xff]  ;;  %v414_v30 = vld [vmem:[#allocation11 + $0x40] sm:$0xff]  ;;  %v415_v31 = vld [vmem:[#allocation11 + $0x48] sm:$0xff] }
  0x91   :  { %891 = vmatprep.subr.bf16.mxu0 %v1204_v0  ;;  %v958_v29 = vpack.c.bf16 %v413_v28, %v412_v27  ;;  %v961_v32 = vpack.c.bf16 %v415_v31, %v414_v30  ;;  %v418_v35 = vld [vmem:[#allocation11 + $0x60] sm:$0xff]  ;;  %v420_v40 = vld [vmem:[#allocation11 + $0x70] sm:$0xff]  ;;  %v421_v41 = vld [vmem:[#allocation11 + $0x78] sm:$0xff] }
  0x92   :  { %914 = vmatpush3.bf16.msra.mxu1 %v913_v36  ;;  %v419_v36 = vld [vmem:[#allocation11 + $0x68] sm:$0xff]  ;;  %v500_v43 = vld [vmem:[#allocation13] sm:$0xff]  ;;  %v503_v47 = vld [vmem:[#allocation13 + $0x18] sm:$0xff] }
  0x93   :  { %915 = vmatprep.subr.bf16.mxu1 %v1204_v0  ;;  %v967_v37 = vpack.c.bf16 %v419_v36, %v418_v35  ;;  %v501_v44 = vld [vmem:[#allocation13 + $0x8] sm:$0xff]  ;;  %v506_v52 = vld [vmem:[#allocation13 + $0x30] sm:$0xff]  ;;  %v508_v55 = vld [vmem:[#allocation13 + $0x40] sm:$0xff] }
  0x94   :  { %893 = vmatpush3.bf16.msra.mxu0 %v892_v33  ;;  %v417_v33 = vld [vmem:[#allocation11 + $0x58] sm:$0xff]  ;;  %v973_v46 = vpack.c.bf16 %v501_v44, %v500_v43  ;;  %v510_v58 = vld [vmem:[#allocation13 + $0x50] sm:$0xff]  ;;  %v512_v61 = vld [vmem:[#allocation13 + $0x60] sm:$0xff] }
  0x95   :  { %894 = vmatprep.subr.bf16.mxu0 %v1204_v0  ;;  %v514_v8 = vld [vmem:[#allocation13 + $0x70] sm:$0xff] }
  0x96   :  { %917 = vmatpush3.bf16.msra.mxu1 %v916_v42  ;;  %v970_v42 = vpack.c.bf16 %v421_v41, %v420_v40  ;;  %v614_v11 = vld [vmem:[%s1449_s8] ss:$0 sm:$0xff] }
  0x97   :  { %918 = vmatprep.subr.bf16.mxu1 %v1204_v0  ;;  %v615_v15 = vld [vmem:[%s1451_s10] ss:$0 sm:$0xff] }
  0x98   :  { %896 = vmatpush3.bf16.msra.mxu0 %v895_v39 }
  0x99   :  { %897 = vmatprep.subr.bf16.mxu0 %v1204_v0 }
  0x9a   :  { %920 = vmatpush3.bf16.msra.mxu1 %v919_v48 }
  0x9b   :  { %921 = vmatprep.subr.bf16.mxu1 %v1204_v0 }
  0x9c   :  { %899 = vmatpush3.bf16.msra.mxu0 %v898_v45  ;;  %v502_v45 = vld [vmem:[#allocation13 + $0x10] sm:$0xff] }
  0x9d   :  { %924 = vmatprep.subr.bf16.mxu0 %v1204_v0  ;;  %v976_v48 = vpack.c.bf16 %v503_v47, %v502_v45 }
  0x9e   :  { %923 = vmatpush3.bf16.msra.mxu1 %v922_v12 }
  0x9f   :  { %734 = vmatmul.mubr.f32.vlgmr.msra.gmra.mrb[0].mxu0 %v130_v49  ;;  %948 = vmatprep.subr.bf16.mxu1 %v1204_v0  ;;  %v504_v49 = vld [vmem:[#allocation13 + $0x20] sm:$0xff] }
  0xa0   :  { %926 = vmatpush3.bf16.msra.mxu0 %v925_v50  ;;  %803 = vmatprep.mubr.msk.f32.mxu0 %vm1205_vm0, %v1206_v1  ;;  %v505_v50 = vld [vmem:[#allocation13 + $0x28] sm:$0xff] }
  0xa1   :  { %927 = vmatprep.subr.bf16.mxu0 %v1204_v0  ;;  %v979_v51 = vpack.c.bf16 %v505_v50, %v504_v49 }
  0xa4   :  { %929 = vmatpush3.bf16.msra.mxu0 %v928_v53  ;;  %v507_v53 = vld [vmem:[#allocation13 + $0x38] sm:$0xff] }
  0xa5   :  { %930 = vmatprep.subr.bf16.mxu0 %v1204_v0  ;;  %v982_v54 = vpack.c.bf16 %v507_v53, %v506_v52 }
  0xa8   :  { %932 = vmatpush3.bf16.msra.mxu0 %v931_v56  ;;  %v509_v56 = vld [vmem:[#allocation13 + $0x48] sm:$0xff] }
  0xa9   :  { %933 = vmatprep.subr.bf16.mxu0 %v1204_v0  ;;  %v985_v57 = vpack.c.bf16 %v509_v56, %v508_v55 }
  0xac   :  { %935 = vmatpush3.bf16.msra.mxu0 %v934_v59  ;;  %v511_v59 = vld [vmem:[#allocation13 + $0x58] sm:$0xff] }
  0xad   :  { %936 = vmatprep.subr.bf16.mxu0 %v1204_v0  ;;  %v988_v60 = vpack.c.bf16 %v511_v59, %v510_v58 }
  0xb0   :  { %938 = vmatpush3.bf16.msra.mxu0 %v937_v62  ;;  %v513_v62 = vld [vmem:[#allocation13 + $0x68] sm:$0xff] }
  0xb1   :  { %939 = vmatprep.subr.bf16.mxu0 %v1204_v0  ;;  %v991_v63 = vpack.c.bf16 %v513_v62, %v512_v61 }
  0xb4   :  { %941 = vmatpush3.bf16.msra.mxu0 %v940_v3  ;;  %v613_v3 = vld [vmem:[%s1447_s6] ss:$0 sm:$0xff] }
  0xb5   :  { %942 = vmatprep.subr.bf16.mxu0 %v1204_v0 }
  0xb8   :  { %944 = vmatpush3.bf16.msra.mxu0 %v943_v6 }
  0xb9   :  { %945 = vmatprep.subr.bf16.mxu0 %v1204_v0 }
  0xbc   :  { %947 = vmatpush3.bf16.msra.mxu0 %v946_v9  ;;  %v515_v9 = vld [vmem:[#allocation13 + $0x78] sm:$0xff] }
  0xbd   :  { %972 = vmatprep.subr.bf16.mxu0 %v1204_v0  ;;  %v994_v10 = vpack.c.bf16 %v515_v9, %v514_v8 }
  0xbf   :  { %804 = vmatmul.mubr.f32.vlgmr.msra.gmra.mrb[2].mxu0 %v224_v13 }
  0xc0   :  { %873 = vmatprep.mubr.msk.f32.mxu0 %vm1205_vm0, %v1206_v1  ;;  %974 = vmatpush3.bf16.msra.mxu0 %v973_v46 }
  0xc1   :  { %975 = vmatprep.subr.bf16.mxu0 %v1204_v0 }
  0xc4   :  { %977 = vmatpush3.bf16.msra.mxu0 %v976_v48 }
  0xc5   :  { %978 = vmatprep.subr.bf16.mxu0 %v1204_v0 }
  0xc8   :  { %980 = vmatpush3.bf16.msra.mxu0 %v979_v51 }
  0xc9   :  { %981 = vmatprep.subr.bf16.mxu0 %v1204_v0 }
  0xcc   :  { %983 = vmatpush3.bf16.msra.mxu0 %v982_v54 }
  0xcd   :  { %984 = vmatprep.subr.bf16.mxu0 %v1204_v0 }
  0xd0   :  { %986 = vmatpush3.bf16.msra.mxu0 %v985_v57 }
  0xd1   :  { %987 = vmatprep.subr.bf16.mxu0 %v1204_v0 }
  0xd4   :  { %989 = vmatpush3.bf16.msra.mxu0 %v988_v60 }
  0xd5   :  { %990 = vmatprep.subr.bf16.mxu0 %v1204_v0 }
  0xd8   :  { %992 = vmatpush3.bf16.msra.mxu0 %v991_v63 }
  0xd9   :  { %993 = vmatprep.subr.bf16.mxu0 %v1204_v0 }
  0xdc   :  { %995 = vmatpush3.bf16.msra.mxu0 %v994_v10 }
 0x172   :  { %v220_v17 = vpop.f32.mrb[0].mxu0 }
 0x173   :  { %v221_v19 = vadd.f32 %v612_v16, %v220_v17  ;;  %v735_v20 = vpop.f32.mrb[1].mxu0 }
 0x175   :  { %769 = vmatmul.mubr.f32.vlgmr.msra.gmra.mrb[0].mxu1 %v221_v19 }
 0x176   :  { %950 = vmatpush3.bf16.msra.mxu1 %v949_v18  ;;  %838 = vmatprep.mubr.msk.f32.mxu1 %vm1205_vm0, %v1206_v1  ;;  %v416_v1 = vld [vmem:[#allocation11 + $0x50] sm:$0xff] }
 0x177   :  { %951 = vmatprep.subr.bf16.mxu1 %v1204_v0  ;;  %v964_v34 = vpack.c.bf16 %v417_v33, %v416_v1 }
 0x17a   :  { %953 = vmatpush3.bf16.msra.mxu1 %v952_v23 }
 0x17b   :  { %954 = vmatprep.subr.bf16.mxu1 %v1204_v0 }
 0x17e   :  { %956 = vmatpush3.bf16.msra.mxu1 %v955_v26 }
 0x17f   :  { %957 = vmatprep.subr.bf16.mxu1 %v1204_v0 }
 0x182   :  { %959 = vmatpush3.bf16.msra.mxu1 %v958_v29 }
 0x183   :  { %960 = vmatprep.subr.bf16.mxu1 %v1204_v0 }
 0x186   :  { %962 = vmatpush3.bf16.msra.mxu1 %v961_v32 }
 0x187   :  { %963 = vmatprep.subr.bf16.mxu1 %v1204_v0 }
 0x18a   :  { %965 = vmatpush3.bf16.msra.mxu1 %v964_v34 }
 0x18b   :  { %966 = vmatprep.subr.bf16.mxu1 %v1204_v0 }
 0x18e   :  { %968 = vmatpush3.bf16.msra.mxu1 %v967_v37 }
 0x18f   :  { %969 = vmatprep.subr.bf16.mxu1 %v1204_v0 }
 0x192   :  { %v393_v38 = vpop.f32.mrb[2].mxu0  ;;  %971 = vmatpush3.bf16.msra.mxu1 %v970_v42 }
 0x193   :  { %v805_v39 = vpop.f32.mrb[3].mxu0 }
 0x248   :  { %v323_v2 = vpop.f32.mrb[0].mxu1 }
 0x249   :  { %v394_v4 = vadd.f32 %v393_v38, %v323_v2  ;;  %v770_v5 = vpop.f32.mrb[1].mxu1 }
 0x24b   :  { %v404_v6 = vadd.f32 %v613_v3, %v394_v4 }
 0x24d   :  { %v405_v7 = vmax.f32 %v404_v6, 0.0 }
 0x24f   :  { %839 = vmatmul.mubr.f32.vlgmr.msra.gmra.mrb[2].mxu1 %v405_v7 }
 0x322   :  { %v495_v12 = vpop.f32.mrb[2].mxu1 }
 0x323   :  { %v496_v0 = vadd.f32 %v614_v11, %v495_v12  ;;  %v840_v13 = vpop.f32.mrb[3].mxu1 }
 0x325   :  { %v499_v14 = vmax.f32 %v496_v0, 0.0 }
 0x327   :  { %874 = vmatmul.mubr.f32.vlgmr.msra.gmra.mrb[4].mxu0 %v499_v14 }
 0x3fa   :  { %v589_v16 = vpop.f32.mrb[4].mxu0 }
 0x3fb   :  { %v590_v17 = vadd.f32 %v615_v15, %v589_v16  ;;  %v875_v18 = vpop.f32.mrb[5].mxu0 }
 0x3fd   :  { %593 = vst [vmem:[#allocation14] sm:$0xff] %v590_v17 }
 0x3fe   :  { %1174 = shalt.err (!%p1171_p4)
}
 0x3ff   :  { %s1175_s13 = scalar_lea.hbm %s1452_s11, 128 }
 0x400   :  { %p1176_p5 = scmp.ne.s32.totalorder %s1452_s11, %s1175_s13  ;;  %p1179_p6 = scmp.lt.u32.totalorder %s1175_s13, %s1452_s11 }
 0x402   :  { %p1181_p7 = pnand %p1179_p6, %p1176_p5 }
 0x404   :  { %1184 = shalt.err (!%p1181_p7)
}
 0x405   :  { %603 = dma.vmem_to_hbm [thread:$0]  %s601_s26, 128, %s1452_s11, [#allocation4]  }
 0x406   :  { %1193 = dma.done.wait [#allocation4], 128  }
 0x407   :  { %1194 = vsyncadd [#allocation4], 4294967168 }
 0x408   :  { %607 = vsyncpa [#allocation3], 1 }
 0x409   :  { %608 = vsyncpa [#allocation6], 1 }
 0x40a   :  { %609 = vsyncpa [#allocation9], 1 }
 0x40b   :  { %610 = vsyncpa [#allocation12], 1 }
 0x40c   :  { %611 = vsyncpa [#allocation4], 1 }

</bundles_post_ra>
